<compile_context>
chip_gen: v5e
topology: v5e:2x2
jax: 0.10.0
libtpu: 0.0.40
codegen_flags: <defaults>
</compile_context>

<pallas_src>
import jax
import jax.numpy as jnp
from jax.experimental import pallas as pl
from jax.experimental.pallas import tpu as pltpu


def _round_up(n, m):
    return ((n + m - 1) // m) * m


def _mlp_kernel(x_ref, w1_ref, b1_ref, w2_ref, b2_ref, w3_ref, b3_ref, o_ref):
    f32 = jnp.float32
    x = x_ref[...].astype(f32)                               # (TB, 2)

    # --- fc1 + ReLU: K=2 contraction on the VPU (two broadcast FMAs). ---
    w1 = w1_ref[...].astype(f32)                             # (2, 64)
    h1 = (x[:, 0:1] * w1[0:1, :]
          + x[:, 1:2] * w1[1:2, :]
          + b1_ref[...].astype(f32))                         # (TB, 64)
    h1 = jnp.maximum(h1, 0.0)

    # --- fc2 + ReLU: the only real matmul -> MXU, f32 accumulation. ---
    h2 = jnp.dot(h1, w2_ref[...].astype(f32),
                 preferred_element_type=f32) + b2_ref[...].astype(f32)
    h2 = jnp.maximum(h2, 0.0)                                # (TB, 128)

    # --- fc3 + Sigmoid: N=1 -> VPU multiply + XLU lane reduction. ---
    w3 = w3_ref[...].astype(f32)                             # (1, 128)
    z = jnp.sum(h2 * w3, axis=-1, keepdims=True) + b3_ref[0]  # (TB, 1)
    o_ref[...] = jax.nn.sigmoid(z)


def policy_network_forward(x, params, *, block_b=256, storage_dtype=None):
    """Fused policy-network forward.

    x: (B, 2) float32 cart-pole states.  For an RL loop, batch as many states /
       timesteps as possible into one call — at B~8 the cost is pure launch
       overhead, so amortize across environments.
    params: w1 (2,64), b1 (1,64), w2 (64,128), b2 (1,128),
            w3 (1,128) [PyTorch fc3 (out,in) layout], b3 (1,).
    storage_dtype: optional narrow dtype (e.g. jnp.bfloat16) used only for the
            HBM->VMEM transfer of x / weights; all arithmetic stays float32.
    """
    B = x.shape[0]
    w1, b1 = params["w1"], params["b1"]
    w2, b2 = params["w2"], params["b2"]
    w3, b3 = params["w3"], params["b3"]

    # Batch tile: <= block_b rows (keeps (TB,64)+(TB,128) f32 intermediates
    # small while still amortizing the ~0.35us per-grid-step overhead),
    # multiple of 16 so bf16 storage packs cleanly along sublanes.
    TB = min(_round_up(block_b, 16), _round_up(max(B, 1), 16))
    Bp = _round_up(B, TB)
    if Bp != B:
        x = jnp.pad(x, ((0, Bp - B), (0, 0)))

    if storage_dtype is not None:
        x = x.astype(storage_dtype)
        w1, b1, w2, b2, w3 = (a.astype(storage_dtype) for a in (w1, b1, w2, b2, w3))
    b3 = b3.astype(jnp.float32)          # scalar bias stays f32 in SMEM

    def pinned(a):                        # whole array, reused across grid steps
        return pl.BlockSpec(a.shape, lambda i: (0, 0))

    out = pl.pallas_call(
        _mlp_kernel,
        out_shape=jax.ShapeDtypeStruct((Bp, 1), jnp.float32),
        grid=(Bp // TB,),
        in_specs=[
            pl.BlockSpec((TB, 2), lambda i: (i, 0)),             # x: tiled batch
            pinned(w1), pinned(b1),
            pinned(w2), pinned(b2),
            pinned(w3),
            pl.BlockSpec(memory_space=pltpu.MemorySpace.SMEM),   # b3 scalar
        ],
        out_specs=pl.BlockSpec((TB, 1), lambda i: (i, 0)),
        compiler_params=pltpu.CompilerParams(
            dimension_semantics=("parallel",)),                  # v7x: 2 TCs
    )(x, w1, b1, w2, b2, w3, b3)

    return out[:B]


def init_params(key):
    """Matches nn.Linear's U(-1/sqrt(fan_in), 1/sqrt(fan_in)) init.

    fc1/fc2 weights are stored pre-transposed as (in, out); fc3 weight is kept
    in PyTorch's (out=1, in=128) layout since the kernel consumes it as a row.
    """
    def uniform(k, shape, fan_in):
        bound = 1.0 / jnp.sqrt(fan_in)
        return jax.random.uniform(k, shape, jnp.float32, -bound, bound)

    k = jax.random.split(key, 6)
    return {
        "w1": uniform(k[0], (2, 64), 2.0),    "b1": uniform(k[1], (1, 64), 2.0),
        "w2": uniform(k[2], (64, 128), 64.0), "b2": uniform(k[3], (1, 128), 64.0),
        "w3": uniform(k[4], (1, 128), 128.0), "b3": uniform(k[5], (1,), 128.0),
    }


def _reference_forward(x, p):
    h1 = jnp.maximum(x @ p["w1"] + p["b1"], 0.0)
    h2 = jnp.maximum(h1 @ p["w2"] + p["b2"], 0.0)
    return jax.nn.sigmoid(h2 @ p["w3"].T + p["b3"])


if __name__ == "__main__":
    key = jax.random.PRNGKey(0)
    kx, kp = jax.random.split(key)

    # Small cart-pole batch (state_dim = 2).
    B = 8
    x = jax.random.normal(kx, (B, 2), jnp.float32)
    params = init_params(kp)

    out = jax.block_until_ready(policy_network_forward(x, params))
    ref = _reference_forward(x, params)
    assert out.shape == (B, 1)
    assert jnp.allclose(out, ref, atol=1e-4, rtol=1e-4), "f32 mismatch vs JAX reference"

    # Larger batch exercising the pipelined batch grid (+ bf16 storage path).
    B2 = 600
    x2 = jax.random.normal(jax.random.PRNGKey(1), (B2, 2), jnp.float32)
    ref2 = _reference_forward(x2, params)

    out2 = jax.block_until_ready(policy_network_forward(x2, params))
    assert out2.shape == (B2, 1)
    assert jnp.allclose(out2, ref2, atol=1e-4, rtol=1e-4), "gridded f32 mismatch"

    out2_bf16 = jax.block_until_ready(
        policy_network_forward(x2, params, storage_dtype=jnp.bfloat16))
    assert jnp.allclose(out2_bf16, ref2, atol=5e-2), "bf16-storage mismatch"

    # TODO(synk): select_action's Bernoulli sampling / .item() is host-side RL
    # control flow and stays outside the kernel (only forward() is a kernel).

    print("KERNEL_OK")
</pallas_src>

<mosaic_0001>
module attributes {stable_mosaic.version = 11 : i64} {
  func.func @_mlp_kernel(%arg0: i32, %arg1: memref<16x2xf32, #tpu.memory_space<vmem>>, %arg2: memref<2x64xf32, #tpu.memory_space<vmem>>, %arg3: memref<1x64xf32, #tpu.memory_space<vmem>>, %arg4: memref<64x128xf32, #tpu.memory_space<vmem>>, %arg5: memref<1x128xf32, #tpu.memory_space<vmem>>, %arg6: memref<1x128xf32, #tpu.memory_space<vmem>>, %arg7: memref<1xf32, #tpu.memory_space<smem>>, %arg8: memref<16x1xf32, #tpu.memory_space<vmem>>) attributes {dimension_semantics = [#tpu.dimension_semantics<parallel>], iteration_bounds = array<i64: 1>, scalar_prefetch = 0 : i64, scratch_operands = 0 : i64, tpu.core_type = #tpu.core_type<tc>, window_params = [{transform_indices = @transform_0, window_bounds = array<i64: 16, 2>}, {pipeline_mode = #tpu.pipeline_mode<synchronous>, transform_indices = @transform_1, window_bounds = array<i64: 2, 64>}, {pipeline_mode = #tpu.pipeline_mode<synchronous>, transform_indices = @transform_2, window_bounds = array<i64: 1, 64>}, {pipeline_mode = #tpu.pipeline_mode<synchronous>, transform_indices = @transform_3, window_bounds = array<i64: 64, 128>}, {pipeline_mode = #tpu.pipeline_mode<synchronous>, transform_indices = @transform_4, window_bounds = array<i64: 1, 128>}, {pipeline_mode = #tpu.pipeline_mode<synchronous>, transform_indices = @transform_5, window_bounds = array<i64: 1, 128>}, {transform_indices = @transform_6, window_bounds = array<i64: 1>}, {transform_indices = @transform_7, window_bounds = array<i64: 16, 1>}]} {
    %c0 = arith.constant 0 : index
    %c0_0 = arith.constant 0 : index
    %0 = vector.load %arg1[%c0, %c0_0] : memref<16x2xf32, #tpu.memory_space<vmem>>, vector<16x2xf32>
    %c0_1 = arith.constant 0 : index
    %c0_2 = arith.constant 0 : index
    %1 = vector.load %arg2[%c0_1, %c0_2] : memref<2x64xf32, #tpu.memory_space<vmem>>, vector<2x64xf32>
    %2 = vector.extract_strided_slice %0 {offsets = [0, 0], sizes = [16, 1], strides = [1, 1]} : vector<16x2xf32> to vector<16x1xf32>
    %3 = vector.extract_strided_slice %1 {offsets = [0, 0], sizes = [1, 64], strides = [1, 1]} : vector<2x64xf32> to vector<1x64xf32>
    %4 = vector.broadcast %2 : vector<16x1xf32> to vector<16x64xf32>
    %5 = vector.broadcast %3 : vector<1x64xf32> to vector<16x64xf32>
    %6 = arith.mulf %4, %5 : vector<16x64xf32>
    %7 = vector.extract_strided_slice %0 {offsets = [0, 1], sizes = [16, 1], strides = [1, 1]} : vector<16x2xf32> to vector<16x1xf32>
    %8 = vector.extract_strided_slice %1 {offsets = [1, 0], sizes = [1, 64], strides = [1, 1]} : vector<2x64xf32> to vector<1x64xf32>
    %9 = vector.broadcast %7 : vector<16x1xf32> to vector<16x64xf32>
    %10 = vector.broadcast %8 : vector<1x64xf32> to vector<16x64xf32>
    %11 = arith.mulf %9, %10 : vector<16x64xf32>
    %12 = arith.addf %6, %11 : vector<16x64xf32>
    %c0_3 = arith.constant 0 : index
    %c0_4 = arith.constant 0 : index
    %13 = vector.load %arg3[%c0_3, %c0_4] : memref<1x64xf32, #tpu.memory_space<vmem>>, vector<1x64xf32>
    %14 = vector.broadcast %13 : vector<1x64xf32> to vector<16x64xf32>
    %15 = arith.addf %12, %14 : vector<16x64xf32>
    %cst = arith.constant 0.000000e+00 : f32
    %16 = vector.broadcast %cst : f32 to vector<16x64xf32>
    %17 = arith.maximumf %15, %16 : vector<16x64xf32>
    %c0_5 = arith.constant 0 : index
    %c0_6 = arith.constant 0 : index
    %18 = vector.load %arg4[%c0_5, %c0_6] : memref<64x128xf32, #tpu.memory_space<vmem>>, vector<64x128xf32>
    %cst_7 = arith.constant dense<0.000000e+00> : vector<16x128xf32>
    %19 = tpu.matmul %17, %18, %cst_7 {dimension_numbers = #tpu.dot_dimension_numbers<[1], [0], [0], [1], [0, 0, 1, 1], [], []>} : vector<16x64xf32>, vector<64x128xf32>, vector<16x128xf32> -> vector<16x128xf32>
    %c0_8 = arith.constant 0 : index
    %c0_9 = arith.constant 0 : index
    %20 = vector.load %arg5[%c0_8, %c0_9] : memref<1x128xf32, #tpu.memory_space<vmem>>, vector<1x128xf32>
    %21 = vector.broadcast %20 : vector<1x128xf32> to vector<16x128xf32>
    %22 = arith.addf %19, %21 : vector<16x128xf32>
    %cst_10 = arith.constant 0.000000e+00 : f32
    %23 = vector.broadcast %cst_10 : f32 to vector<16x128xf32>
    %24 = arith.maximumf %22, %23 : vector<16x128xf32>
    %c0_11 = arith.constant 0 : index
    %c0_12 = arith.constant 0 : index
    %25 = vector.load %arg6[%c0_11, %c0_12] : memref<1x128xf32, #tpu.memory_space<vmem>>, vector<1x128xf32>
    %26 = vector.broadcast %25 : vector<1x128xf32> to vector<16x128xf32>
    %27 = arith.mulf %24, %26 : vector<16x128xf32>
    %cst_13 = arith.constant dense<0.000000e+00> : vector<16xf32>
    %28 = vector.multi_reduction <add>, %27, %cst_13 [1] : vector<16x128xf32> to vector<16xf32>
    %29 = vector.shape_cast %28 : vector<16xf32> to vector<16x1xf32>
    %c0_14 = arith.constant 0 : index
    %30 = memref.load %arg7[%c0_14] : memref<1xf32, #tpu.memory_space<smem>>
    %31 = vector.broadcast %30 : f32 to vector<16x1xf32>
    %32 = arith.addf %29, %31 : vector<16x1xf32>
    %33 = arith.negf %32 : vector<16x1xf32>
    %34 = math.exp %33 : vector<16x1xf32>
    %cst_15 = arith.constant 1.000000e+00 : f32
    %35 = vector.broadcast %cst_15 : f32 to vector<16x1xf32>
    %36 = arith.addf %35, %34 : vector<16x1xf32>
    %37 = arith.divf %35, %36 : vector<16x1xf32>
    %c0_16 = arith.constant 0 : index
    %c0_17 = arith.constant 0 : index
    %38 = vector.load %arg8[%c0_16, %c0_17] : memref<16x1xf32, #tpu.memory_space<vmem>>, vector<16x1xf32>
    tpu.vector_store %arg8[%c0_16, %c0_17], %37 {strides = array<i32>} : memref<16x1xf32, #tpu.memory_space<vmem>>, vector<16x1xf32>,
    return
  }
  func.func @transform_0(%arg0: i32) -> (i32, i32) {
    %c0_i32 = arith.constant 0 : i32
    %c0_i32_0 = arith.constant 0 : i32
    return %arg0, %c0_i32 : i32, i32
  }
  func.func @transform_1(%arg0: i32) -> (i32, i32) {
    %c0_i32 = arith.constant 0 : i32
    %c0_i32_0 = arith.constant 0 : i32
    %c0_i32_1 = arith.constant 0 : i32
    return %c0_i32, %c0_i32_0 : i32, i32
  }
  func.func @transform_2(%arg0: i32) -> (i32, i32) {
    %c0_i32 = arith.constant 0 : i32
    %c0_i32_0 = arith.constant 0 : i32
    %c0_i32_1 = arith.constant 0 : i32
    return %c0_i32, %c0_i32_0 : i32, i32
  }
  func.func @transform_3(%arg0: i32) -> (i32, i32) {
    %c0_i32 = arith.constant 0 : i32
    %c0_i32_0 = arith.constant 0 : i32
    %c0_i32_1 = arith.constant 0 : i32
    return %c0_i32, %c0_i32_0 : i32, i32
  }
  func.func @transform_4(%arg0: i32) -> (i32, i32) {
    %c0_i32 = arith.constant 0 : i32
    %c0_i32_0 = arith.constant 0 : i32
    %c0_i32_1 = arith.constant 0 : i32
    return %c0_i32, %c0_i32_0 : i32, i32
  }
  func.func @transform_5(%arg0: i32) -> (i32, i32) {
    %c0_i32 = arith.constant 0 : i32
    %c0_i32_0 = arith.constant 0 : i32
    %c0_i32_1 = arith.constant 0 : i32
    return %c0_i32, %c0_i32_0 : i32, i32
  }
  func.func @transform_6(%arg0: i32) -> i32 {
    %c0_i32 = arith.constant 0 : i32
    %c0_i32_0 = arith.constant 0 : i32
    return %c0_i32 : i32
  }
  func.func @transform_7(%arg0: i32) -> (i32, i32) {
    %c0_i32 = arith.constant 0 : i32
    %c0_i32_0 = arith.constant 0 : i32
    return %arg0, %c0_i32 : i32, i32
  }
}

</mosaic_0001>

<bundles_post_ra>
// kernel: tpu_custom_call.1
= control target key start
LH: loop header
LB: loop body
LE: loop exit
PB: predicated region body
PF: predicated region fallthrough
CT: control target
= control target key end

     0   :  { %13 = vsyncpa [#allocation4], 0  ;;  %s241_s27 = smov [#allocation3]   ;;  %s242_s29 = smov 128   ;;  %s318_s0 = inlined_call_operand.vmem [shape: f32[16,2], index: 0, kind: input, shape index: {}]   ;;  %s319_s1 = inlined_call_operand.vmem [shape: f32[2,64], index: 1, kind: input, shape index: {}]   ;;  %s320_s2 = inlined_call_operand.vmem [shape: f32[1,64], index: 2, kind: input, shape index: {}]   ;;  %s321_s3 = inlined_call_operand.hbm [shape: f32[64,128], index: 3, kind: input, shape index: {}]   ;;  %s322_s4 = inlined_call_operand.vmem [shape: f32[1,128], index: 4, kind: input, shape index: {}]   ;;  %s323_s5 = inlined_call_operand.vmem [shape: f32[1,128], index: 5, kind: input, shape index: {}]   ;;  %s324_s6 = inlined_call_operand.<no memory space> [shape: f32[1], index: 6, kind: input, shape index: {}]   ;;  %s325_s7 = inlined_call_operand.vmem [shape: f32[16,1], index: 7, kind: output, shape index: {}]  }
   0x1   :  { %s24_s26 = sshll.u32 %s321_s3, 4  ;;  %s26_s28 = sshll.u32 %s241_s27, 4  ;;  %s25_s26 = int_to_ptr.hbm [resolvable:$true] %s24_s26  ;;  %s27_s28 = int_to_ptr.vmem [resolvable:$true] %s26_s28 }
   0x2   :  { %s243_s30 = smov 8  }
   0x3   :  { %32 = dma.hbm_to_vmem [thread:$0]  %s25_s26, 1024, %s27_s28, [#allocation4], %s242_s29, %s242_s29, %s243_s30  }
   0x4   :  { %239 = dma.done.wait [#allocation4], 1024  }
   0x5   :  { %240 = vsyncadd [#allocation4], 4294966272  ;;  %v244_v0 = vmov 1   ;;  %v245_v1 = vmov 0   ;;  %v43_v2 = vld [vmem:[%s318_s0] sm:$0xff]  ;;  %v87_v3 = vld [vmem:[#allocation3 + $0x38] sm:$0xff]  ;;  %v135_v40 = vstv %s324_s6 }
   0x6   :  { %202 = vset.pattern.permute.xlu1 %v244_v0  ;;  %201 = vset.pattern.permute.xlu0 %v245_v1  ;;  %v86_v4 = vld [vmem:[#allocation3 + $0x30] sm:$0xff]  ;;  %v85_v5 = vld [vmem:[#allocation3 + $0x28] sm:$0xff]  ;;  %v84_v6 = vld [vmem:[#allocation3 + $0x20] sm:$0xff]  ;;  %vm92_vm0 = vcmask 523264   ;;  %vm176_vm3 = vcmask 7168  }
   0x7   :  { %60 = vperm.xlu1 %202, %v43_v2   ;;  %48 = vperm.xlu0 %201, %v43_v2   ;;  %v44_v7 = vld [vmem:[%s318_s0 + $0x8] sm:$0xff]  ;;  %v83_v8 = vld [vmem:[#allocation3 + $0x18] sm:$0xff]  ;;  %v82_v9 = vld [vmem:[#allocation3 + $0x10] sm:$0xff] }
   0x8   :  { %107 = vmatpush.msra.mxu0 %v87_v3  ;;  %188 = vmatpush.msra.mxu1 %v87_v3  ;;  %v81_v10 = vld [vmem:[#allocation3 + $0x8] sm:$0xff]  ;;  %v80_v11 = vld [vmem:[#allocation3] sm:$0xff] }
   0x9   :  { %v45_v12 = vld [vmem:[%s319_s1] sm:$0x3] }
   0xa   :  { %108 = vmatpush.msra.mxu0 %v86_v4  ;;  %189 = vmatpush.msra.mxu1 %v86_v4  ;;  %v67_v13 = vperm.slane %v45_v12, 1  ;;  %v56_v14 = vperm.slane %v45_v12, 0  ;;  %v204_v19 = vld [vmem:[%s320_s2] ss:$0 sm:$0xff] }
   0xb   :  { %v205_v30 = vld [vmem:[%s322_s4] ss:$0 sm:$0xff] }
   0xc   :  { %109 = vmatpush.msra.mxu0 %v85_v5  ;;  %190 = vmatpush.msra.mxu1 %v85_v5  ;;  %v206_v33 = vld [vmem:[%s323_s5] ss:$0 sm:$0xff] }
   0xe   :  { %110 = vmatpush.msra.mxu0 %v84_v6  ;;  %191 = vmatpush.msra.mxu1 %v84_v6 }
   0xf   :  { %64 = vperm.xlu1 %202, %v44_v7   ;;  %53 = vperm.xlu0 %201, %v44_v7  }
  0x10   :  { %111 = vmatpush.msra.mxu0 %v83_v8  ;;  %192 = vmatpush.msra.mxu1 %v83_v8 }
  0x12   :  { %112 = vmatpush.msra.mxu0 %v82_v9  ;;  %193 = vmatpush.msra.mxu1 %v82_v9 }
  0x14   :  { %113 = vmatpush.msra.mxu0 %v81_v10  ;;  %194 = vmatpush.msra.mxu1 %v81_v10 }
  0x16   :  { %114 = vmatpush.msra.mxu0 %v80_v11  ;;  %195 = vmatpush.msra.mxu1 %v80_v11 }
  0x17   :  { %203 = vset.pattern.permute.xlu0 %v244_v0 }
  0x79   :  { %v61_v15 = vpop.permute.xlu1 %60  ;;  %v49_v16 = vpop.permute.xlu0 %48 }
  0x7a   :  { %v68_v17 = vmul.f32 %v67_v13, %v61_v15  ;;  %v57_v18 = vmul.f32 %v56_v14, %v49_v16 }
  0x7c   :  { %v70_v20 = vadd.f32 %v68_v17, %v57_v18 }
  0x7e   :  { %v76_v21 = vadd.f32 %v204_v19, %v70_v20 }
  0x80   :  { %v78_v22 = vmax.f32 %v76_v21, 0.0 }
  0x81   :  { %v65_v23 = vpop.permute.xlu1 %64  ;;  %v54_v24 = vpop.permute.xlu0 %53 }
  0x82   :  { %v69_v25 = vmul.f32 %v67_v13, %v65_v23  ;;  %v58_v26 = vmul.f32 %v56_v14, %v54_v24  ;;  %184 = vmatmul.msk.f32.vlgmr.msra.gmra.mxu0 %vm92_vm0, %v78_v22 }
  0x84   :  { %v71_v27 = vadd.f32 %v69_v25, %v58_v26 }
  0x86   :  { %v77_v28 = vadd.f32 %v204_v19, %v71_v27 }
  0x88   :  { %v79_v29 = vmax.f32 %v77_v28, 0.0 }
  0x8a   :  { %185 = vmatmul.msk.f32.vlgmr.msra.gmra.mxu1 %vm92_vm0, %v79_v29 }
  0xff   :  { %v116_v31 = vpop.f32.mrf.mxu0 }
 0x100   :  { %v117_v32 = vadd.f32 %v205_v30, %v116_v31 }
 0x102   :  { %v122_v34 = vmax.f32 %v117_v32, 0.0 }
 0x104   :  { %v128_v35 = vmul.f32 %v206_v33, %v122_v34 }
 0x106   :  { %130 = vadd.xlane.f32.xlu2 %v128_v35 }
 0x107   :  { %v119_v36 = vpop.f32.mrf.mxu1 }
 0x108   :  { %v120_v37 = vadd.f32 %v205_v30, %v119_v36 }
 0x10a   :  { %v123_v38 = vmax.f32 %v120_v37, 0.0 }
 0x10c   :  { %v129_v39 = vmul.f32 %v206_v33, %v123_v38 }
 0x10e   :  { %132 = vadd.xlane.f32.xlu2 %v129_v39 }
 0x179   :  { %v131_v41 = vpop.xlane.xlu2 %130 }
 0x17a   :  { %v136_v42 = vadd.f32 %v135_v40, %v131_v41 }
 0x17c   :  { %v186_v43 = vmul.f32 -1.442695, %v136_v42 }
 0x17e   :  { %207 = vpow2.f32 %v186_v43 }
 0x181   :  { %v133_v44 = vpop.xlane.xlu2 %132 }
 0x182   :  { %v137_v45 = vadd.f32 %v135_v40, %v133_v44 }
 0x184   :  { %v208_v46 = vpop.eup %207  ;;  %v187_v47 = vmul.f32 -1.442695, %v137_v45 }
 0x185   :  { %v144_v48 = vadd.f32 1.0, %v208_v46 }
 0x186   :  { %209 = vpow2.f32 %v187_v47 }
 0x187   :  { %211 = vrcp.f32 %v144_v48  ;;  %v157_v54 = vand.u32 2147483648, %v144_v48  ;;  %v155_v56 = vand.u32 2147483647, %v144_v48  ;;  %vm151_vm2 = vweird.f32 %v144_v48 }
 0x189   :  { %v158_v59 = vor.u32 1.1754944e-38, %v157_v54  ;;  %vm156_vm5 = vcmp.eq.f32.partialorder %v155_v56, 8.507059e+37 }
 0x18c   :  { %v210_v49 = vpop.eup %209 }
 0x18d   :  { %v212_v50 = vpop.eup %211  ;;  %v145_v51 = vadd.f32 1.0, %v210_v49 }
 0x18e   :  { %v147_v52 = vmul.f32 %v212_v50, %v144_v48  ;;  %vm152_vm1 = vweird.f32 %v212_v50 }
 0x18f   :  { %213 = vrcp.f32 %v145_v51  ;;  %vm153_vm4 = vmor %vm151_vm2, %vm152_vm1  ;;  %v172_v0 = vand.u32 2147483648, %v145_v51  ;;  %v170_v2 = vand.u32 2147483647, %v145_v51  ;;  %vm166_vm7 = vweird.f32 %v145_v51 }
 0x190   :  { %v148_v53 = vsub.f32 1.0, %v147_v52 }
 0x191   :  { %v173_v4 = vor.u32 1.1754944e-38, %v172_v0  ;;  %vm171_vm9 = vcmp.eq.f32.partialorder %v170_v2, 8.507059e+37 }
 0x192   :  { %v149_v55 = vmul.f32 %v212_v50, %v148_v53 }
 0x194   :  { %v150_v57 = vadd.f32 %v212_v50, %v149_v55 }
 0x195   :  { %v214_v58 = vpop.eup %213 }
 0x196   :  { %v154_v60 = vsel %vm153_vm4, %v212_v50, %v150_v57  ;;  %v162_v61 = vmul.f32 %v214_v58, %v145_v51  ;;  %vm167_vm6 = vweird.f32 %v214_v58 }
 0x197   :  { %v159_v62 = vsel %vm156_vm5, %v158_v59, %v154_v60  ;;  %vm168_vm8 = vmor %vm166_vm7, %vm167_vm6 }
 0x198   :  { %177 = vst.msk [vmem:[%s325_s7] sm:$0xff] %vm176_vm3, %v159_v62  ;;  %v163_v63 = vsub.f32 1.0, %v162_v61 }
 0x19a   :  { %v164_v1 = vmul.f32 %v214_v58, %v163_v63 }
 0x19c   :  { %v165_v3 = vadd.f32 %v214_v58, %v164_v1 }
 0x19e   :  { %v169_v5 = vsel %vm168_vm8, %v214_v58, %v165_v3 }
 0x19f   :  { %v174_v6 = vsel %vm171_vm9, %v173_v4, %v169_v5 }
 0x1a0   :  { %178 = vst.msk [vmem:[%s325_s7 + $0x8] sm:$0xff] %vm176_vm3, %v174_v6 }
 0x1a1   :  { %183 = vsyncpa [#allocation4], 1 }

</bundles_post_ra>
